<compile_context>
chip_gen: v7x
topology: tpu7x:2x2x1
jax: 0.10.0
libtpu: 0.0.40
codegen_flags: <defaults>
</compile_context>

<pallas_src>
import jax
import jax.numpy as jnp
from jax import lax
from jax.experimental import pallas as pl
from jax.experimental.pallas import tpu as pltpu


# --------------------------- VMEM limit helper --------------------------------

def _vmem_cap_bytes():
    try:
        return int(pltpu.get_tpu_info().vmem_capacity_bytes)
    except Exception:
        return 64 << 20          # conservative (v7x per-TC) fallback


def _vmem_limit_bytes(nbytes_list):
    """Scoped-VMEM limit from the real buffer footprint (2x for pipeline double
    buffers + headroom), clamped to the chip's physical VMEM minus headroom so
    v5e/v6e can use up to ~120 MiB while v7x stays below 64 MiB."""
    cap = _vmem_cap_bytes()
    need = 2 * int(sum(nbytes_list)) + (4 << 20)
    lo = 32 << 20
    hi = max(cap - (8 << 20), lo)
    return int(min(max(need, lo), hi))


def _nbytes(shape, dtype):
    n = 1
    for s in shape:
        n *= int(s)
    return n * jnp.dtype(dtype).itemsize


# --------------------- fused multi-layer LSTM kernel ---------------------------

def _make_fused_lstm_kernel(n_layer, T, Bp, H):
    def kernel(*args):
        x_ref, h0_ref, c0_ref = args[:3]
        layers = [args[3 + 3 * l: 6 + 3 * l] for l in range(n_layer)]
        out_ref = args[3 + 3 * n_layer]        # (T*Bp, H)  bf16: last layer's sequence
        xw_scr = args[4 + 3 * n_layer]         # (T*Bp, 4H) bf16: input proj + bias

        for l, (wih_ref, whh_ref, b_ref) in enumerate(layers):
            # ---- hoisted input projection: ONE (M, D) @ (D, 4H) MXU matmul -------
            # Layer 0 projects [emb ; z]; layer l>0 projects the previous layer's
            # hidden sequence, already resident in VMEM (out_ref) -> no HBM trip.
            x_in = x_ref[...] if l == 0 else out_ref[...]
            xw = jnp.dot(x_in, wih_ref[...], preferred_element_type=jnp.float32)
            # bias (b_ih + b_hh) added once per layer, outside the time loop
            xw_scr[...] = (xw + b_ref[...]).astype(jnp.bfloat16)

            # ---- serial recurrence; h/c carried as f32 values ---------------------
            def step(t, carry):
                h, c = carry
                row = pl.multiple_of(t * Bp, Bp)          # bf16-packing aligned
                # single fused (Bp, H) @ (H, 4H) recurrent matmul for all 4 gates
                rec = jnp.dot(h.astype(jnp.bfloat16), whh_ref[...],
                              preferred_element_type=jnp.float32)
                pre = xw_scr[pl.ds(row, Bp), :].astype(jnp.float32) + rec
                i_p = pre[:, 0 * H:1 * H]
                f_p = pre[:, 1 * H:2 * H]
                g_p = pre[:, 2 * H:3 * H]
                o_p = pre[:, 3 * H:4 * H]
                # sigmoid(x) = 0.5*(tanh(0.5x)+1): one EUP push per gate
                i = 0.5 * (jnp.tanh(0.5 * i_p) + 1.0)
                f = 0.5 * (jnp.tanh(0.5 * f_p) + 1.0)
                o = 0.5 * (jnp.tanh(0.5 * o_p) + 1.0)
                g = jnp.tanh(g_p)
                c_new = f * c + i * g
                h_new = o * jnp.tanh(c_new)
                out_ref[pl.ds(row, Bp), :] = h_new.astype(jnp.bfloat16)
                return h_new, c_new

            # PyTorch's LSTM_decoder repeats the same (h0, c0) for every layer.
            lax.fori_loop(0, T, step, (h0_ref[...], c0_ref[...]))

    return kernel


def fused_lstm(x_flat, h0, c0, layer_params, T, Bp, H):
    """Run all LSTM layers in one pallas_call.

    x_flat : (T*Bp, E+Z) bf16, time-major flattened (row = t*Bp + b), z concatenated
    h0, c0 : (Bp, H) f32
    layer_params: list of (wih (D,4H) bf16, whh (H,4H) bf16, b (1,4H) f32) per layer.
    Returns the last layer's hidden sequence (T*Bp, H) bf16.
    """
    M = x_flat.shape[0]
    n_layer = len(layer_params)

    in_specs = [pl.BlockSpec(x_flat.shape, lambda i: (0, 0)),
                pl.BlockSpec((Bp, H), lambda i: (0, 0)),
                pl.BlockSpec((Bp, H), lambda i: (0, 0))]
    flat_inputs = [x_flat, h0, c0]
    for (wih, whh, b) in layer_params:
        in_specs += [pl.BlockSpec(wih.shape, lambda i: (0, 0)),
                     pl.BlockSpec(whh.shape, lambda i: (0, 0)),
                     pl.BlockSpec(b.shape, lambda i: (0, 0))]
        flat_inputs += [wih, whh, b]

    footprint = [int(a.size) * a.dtype.itemsize for a in flat_inputs]
    footprint += [_nbytes((M, 4 * H), jnp.bfloat16),      # xw scratch
                  _nbytes((M, H), jnp.bfloat16)]          # output sequence

    return pl.pallas_call(
        _make_fused_lstm_kernel(n_layer, T, Bp, H),
        out_shape=jax.ShapeDtypeStruct((M, H), jnp.bfloat16),
        grid=(1,),   # whole recurrence inside one program: no per-step grid overhead
        in_specs=in_specs,
        out_specs=pl.BlockSpec((M, H), lambda i: (0, 0)),
        scratch_shapes=[pltpu.VMEM((M, 4 * H), jnp.bfloat16)],
        compiler_params=pltpu.CompilerParams(
            dimension_semantics=("arbitrary",),
            vmem_limit_bytes=_vmem_limit_bytes(footprint)),
    )(*flat_inputs)


# ----------- tiled fused decoder_fc + cross-entropy (online logsumexp) ---------

def _make_ce_kernel(pad_idx, n_vt, tv):
    def kernel(h_ref, tgt_ref, w_ref, b_ref, sum_ref, cnt_ref, m_scr, l_scr, tl_scr):
        v = pl.program_id(1)

        @pl.when(v == 0)
        def _():
            m_scr[...] = jnp.full(m_scr.shape, -1e30, dtype=jnp.float32)
            l_scr[...] = jnp.zeros(l_scr.shape, dtype=jnp.float32)
            tl_scr[...] = jnp.zeros(tl_scr.shape, dtype=jnp.float32)

        # h rows arrive already in bf16; f32 MXU accumulation
        logits = jnp.dot(h_ref[...], w_ref[...],
                         preferred_element_type=jnp.float32) + b_ref[...]

        # online (flash-style) logsumexp across vocab tiles
        m_prev = m_scr[...]
        m_new = jnp.maximum(m_prev, jnp.max(logits, axis=-1, keepdims=True))
        alpha = jnp.exp(m_prev - m_new)
        l_scr[...] = alpha * l_scr[...] + jnp.sum(jnp.exp(logits - m_new),
                                                  axis=-1, keepdims=True)
        m_scr[...] = m_new

        tgt = tgt_ref[...]                                        # (tn, 1) int32
        col = lax.broadcasted_iota(jnp.int32, logits.shape, 1) + v * tv
        onehot = col == tgt
        tl_scr[...] += jnp.sum(jnp.where(onehot, logits, 0.0), axis=-1, keepdims=True)

        @pl.when(v == n_vt - 1)
        def _():
            lse = m_scr[...] + jnp.log(l_scr[...])
            valid = tgt != pad_idx
            nll = jnp.where(valid, lse - tl_scr[...], 0.0)
            sum_ref[0, 0, 0] = jnp.sum(nll)
            cnt_ref[0, 0, 0] = jnp.sum(valid.astype(jnp.float32))

    return kernel


def decoder_fc_ce(h_rows, tgt_rows, w_fc, b_fc, pad_idx):
    N, H = h_rows.shape
    V = w_fc.shape[-1]

    # Fixed large row tile (fills MXU rows, amortizes grid-step overhead); pad N
    # with pad_idx targets so padded rows contribute 0 to both sum and count.
    tn = 256 if N >= 256 else max(16, -(-N // 16) * 16)
    Np = -(-N // tn) * tn
    if Np != N:
        h_rows = jnp.pad(h_rows, ((0, Np - N), (0, 0)))
        tgt_rows = jnp.pad(tgt_rows, ((0, Np - N), (0, 0)), constant_values=pad_idx)
    n_rt = Np // tn

    # Vocab tiling (lane-aligned) with online logsumexp; single tile if V is small
    # or not a multiple of 128.
    tv = V
    for cand in (512, 256, 128):
        if V % cand == 0 and V > cand:
            tv = cand
            break
    n_vt = V // tv

    footprint = [_nbytes((tn, H), jnp.bfloat16),
                 _nbytes((tn, 1), jnp.int32),
                 _nbytes((H, tv), jnp.bfloat16),
                 _nbytes((1, tv), jnp.float32),
                 _nbytes((tn, tv), jnp.float32),      # logits temporary
                 3 * _nbytes((tn, 1), jnp.float32),   # m / l / target-logit scratch
                 2 * _nbytes((n_rt, 1, 1), jnp.float32)]

    sums, cnts = pl.pallas_call(
        _make_ce_kernel(pad_idx, n_vt, tv),
        out_shape=(jax.ShapeDtypeStruct((n_rt, 1, 1), jnp.float32),
                   jax.ShapeDtypeStruct((n_rt, 1, 1), jnp.float32)),
        grid=(n_rt, n_vt),
        in_specs=[pl.BlockSpec((tn, H), lambda i, v: (i, 0)),
                  pl.BlockSpec((tn, 1), lambda i, v: (i, 0)),
                  pl.BlockSpec((H, tv), lambda i, v: (0, v)),
                  pl.BlockSpec((1, tv), lambda i, v: (0, v))],
        out_specs=(pl.BlockSpec((1, 1, 1), lambda i, v: (i, 0, 0)),
                   pl.BlockSpec((1, 1, 1), lambda i, v: (i, 0, 0))),
        scratch_shapes=[pltpu.VMEM((tn, 1), jnp.float32),
                        pltpu.VMEM((tn, 1), jnp.float32),
                        pltpu.VMEM((tn, 1), jnp.float32)],
        compiler_params=pltpu.CompilerParams(
            dimension_semantics=("parallel", "arbitrary"),
            vmem_limit_bytes=_vmem_limit_bytes(footprint)),
    )(h_rows, tgt_rows, w_fc, b_fc)

    # Guarded mean: no NaN if every (shifted) target happens to be the pad token.
    return jnp.sum(sums) / jnp.maximum(jnp.sum(cnts), 1.0)


# ------------------------------- forward (glue) --------------------------------

def lstm_decoder_forward(params, padded_x, lengths, z, pad_idx):
    del lengths  # pack_padded_sequence handled via ignore_index masking of the loss
    x_emb = jnp.take(params["emb"], padded_x, axis=0)            # (B, T, E)  glue gather
    B, T, E = x_emb.shape
    H = params["lstm"][0]["w_hh_t"].shape[0]
    d_z = z.shape[-1]
    Bp = -(-B // 16) * 16     # pad batch to 16 sublanes (bf16 packing alignment)

    # map_z2hc: tiny (B, Z) @ (Z, 2H) linear kept in plain JAX (glue)
    hc0 = z @ params["w_z2hc"].T + params["b_z2hc"]              # (B, 2H)
    h0 = jnp.zeros((Bp, H), jnp.float32).at[:B].set(hc0[:, :H])
    c0 = jnp.zeros((Bp, H), jnp.float32).at[:B].set(hc0[:, H:])

    # layer-0 input = [x_emb ; z] (z constant over time), time-major, batch-padded,
    # flattened rows (row = t*Bp + b); bf16 MXU operands
    x_in = jnp.concatenate(
        [x_emb, jnp.broadcast_to(z[:, None, :], (B, T, d_z))], axis=-1)
    x_tb = jnp.transpose(x_in, (1, 0, 2)).astype(jnp.float32)    # (T, B, E+Z)
    x_tb = jnp.pad(x_tb, ((0, 0), (0, Bp - B), (0, 0)))
    x_flat = x_tb.reshape(T * Bp, E + d_z).astype(jnp.bfloat16)

    layer_params = []
    for lyr in params["lstm"]:
        layer_params.append((lyr["w_ih_t"].astype(jnp.bfloat16),   # (D, 4H)
                             lyr["w_hh_t"].astype(jnp.bfloat16),   # (H, 4H)
                             lyr["b"].astype(jnp.float32)))        # (1, 4H)

    out = fused_lstm(x_flat, h0, c0, layer_params, T, Bp, H)       # (T*Bp, H) bf16

    # yhat[:, :-1]  <->  rows with t < T-1;  targets = padded_x[:, 1:]
    N = (T - 1) * Bp
    h_rows = out[:N]
    tgt_tb = jnp.transpose(padded_x[:, 1:], (1, 0)).astype(jnp.int32)        # (T-1, B)
    tgt_tb = jnp.pad(tgt_tb, ((0, 0), (0, Bp - B)), constant_values=pad_idx)
    tgt_rows = tgt_tb.reshape(N, 1)

    return decoder_fc_ce(h_rows, tgt_rows,
                         params["w_fc_t"].astype(jnp.bfloat16),
                         params["b_fc"].astype(jnp.float32), pad_idx)


# ------------------------------ pure-JAX reference ------------------------------

def reference_loss(params, padded_x, lengths, z, pad_idx):
    del lengths
    x_emb = jnp.take(params["emb"], padded_x, axis=0)
    B, T, _ = x_emb.shape
    z0 = jnp.broadcast_to(z[:, None, :], (B, T, z.shape[-1]))
    x_input = jnp.concatenate([x_emb, z0], axis=-1)
    hc0 = z @ params["w_z2hc"].T + params["b_z2hc"]
    H = params["lstm"][0]["w_hh_t"].shape[0]
    h0, c0 = hc0[:, :H], hc0[:, H:]

    seq = jnp.transpose(x_input, (1, 0, 2)).astype(jnp.float32)
    for lyr in params["lstm"]:
        def step(carry, x_t, lyr=lyr):
            h, c = carry
            gates = x_t @ lyr["w_ih_t"] + h @ lyr["w_hh_t"] + lyr["b"][0]
            i, f, g, o = jnp.split(gates, 4, axis=-1)
            c = jax.nn.sigmoid(f) * c + jax.nn.sigmoid(i) * jnp.tanh(g)
            h = jax.nn.sigmoid(o) * jnp.tanh(c)
            return (h, c), h
        _, seq = jax.lax.scan(step, (h0, c0), seq)

    logits = seq[:T - 1].reshape(-1, H) @ params["w_fc_t"] + params["b_fc"][0]
    tgt = jnp.transpose(padded_x[:, 1:], (1, 0)).reshape(-1)
    lse = jax.nn.logsumexp(logits, axis=-1)
    nll = lse - jnp.take_along_axis(logits, tgt[:, None], axis=-1)[:, 0]
    valid = tgt != pad_idx
    return jnp.sum(jnp.where(valid, nll, 0.0)) / jnp.sum(valid)


# ----------------------------------- main ---------------------------------------

if __name__ == "__main__":
    # small config consistent with the module
    n_vocab, pad = 16, 0
    d_emb, d_z, d_d_h, n_layer = 16, 8, 32, 2
    B, T = 2, 8

    key = jax.random.PRNGKey(0)
    ks = jax.random.split(key, 16)

    def init(k, shape, scale=0.1):
        return (scale * jax.random.normal(k, shape)).astype(jnp.float32)

    params = {
        "emb": init(ks[0], (n_vocab, d_emb)),
        "w_z2hc": init(ks[1], (2 * d_d_h, d_z)),
        "b_z2hc": init(ks[2], (2 * d_d_h,)),
        "w_fc_t": init(ks[3], (d_d_h, n_vocab)),
        "b_fc": init(ks[4], (1, n_vocab)),
        "lstm": [],
    }
    for l in range(n_layer):
        d_in = d_emb + d_z if l == 0 else d_d_h
        kk = jax.random.split(ks[5 + l], 4)
        params["lstm"].append({
            "w_ih_t": init(kk[0], (d_in, 4 * d_d_h)),
            "w_hh_t": init(kk[1], (d_d_h, 4 * d_d_h)),
            # b = b_ih + b_hh (combined), stored as (1, 4H)
            "b": (init(kk[2], (1, 4 * d_d_h)) + init(kk[3], (1, 4 * d_d_h))),
        })

    # deterministic inputs: tokens in [1, n_vocab), padded with pad=0
    lengths = jnp.array([8, 5], dtype=jnp.int32)          # sorted descending
    tok_key, z_key = jax.random.split(ks[10])
    padded_x = jax.random.randint(tok_key, (B, T), 1, n_vocab, dtype=jnp.int32)
    pos = jnp.arange(T)[None, :]
    padded_x = jnp.where(pos < lengths[:, None], padded_x, pad)
    z = (0.5 * jax.random.normal(z_key, (B, d_z))).astype(jnp.float32)

    loss = lstm_decoder_forward(params, padded_x, lengths, z, pad)
    loss = jax.block_until_ready(loss)

    ref = jax.block_until_ready(reference_loss(params, padded_x, lengths, z, pad))

    assert jnp.isfinite(loss), f"non-finite loss: {loss}"
    assert jnp.allclose(loss, ref, rtol=2e-2, atol=2e-2), (loss, ref)
    print("KERNEL_OK")
</pallas_src>

<mosaic_0001>
module attributes {stable_mosaic.version = 11 : i64} {
  func.func @kernel(%arg0: i32, %arg1: memref<128x24xbf16, #tpu.memory_space<vmem>>, %arg2: memref<16x32xf32, #tpu.memory_space<vmem>>, %arg3: memref<16x32xf32, #tpu.memory_space<vmem>>, %arg4: memref<24x128xbf16, #tpu.memory_space<vmem>>, %arg5: memref<32x128xbf16, #tpu.memory_space<vmem>>, %arg6: memref<1x128xf32, #tpu.memory_space<vmem>>, %arg7: memref<32x128xbf16, #tpu.memory_space<vmem>>, %arg8: memref<32x128xbf16, #tpu.memory_space<vmem>>, %arg9: memref<1x128xf32, #tpu.memory_space<vmem>>, %arg10: memref<128x32xbf16, #tpu.memory_space<vmem>>, %arg11: memref<128x128xbf16, #tpu.memory_space<vmem>>) attributes {dimension_semantics = [#tpu.dimension_semantics<arbitrary>], iteration_bounds = array<i64: 1>, scalar_prefetch = 0 : i64, scratch_operands = 1 : i64, tpu.core_type = #tpu.core_type<tc>, window_params = [{pipeline_mode = #tpu.pipeline_mode<synchronous>, transform_indices = @transform_0, window_bounds = array<i64: 128, 24>}, {pipeline_mode = #tpu.pipeline_mode<synchronous>, transform_indices = @transform_1, window_bounds = array<i64: 16, 32>}, {pipeline_mode = #tpu.pipeline_mode<synchronous>, transform_indices = @transform_2, window_bounds = array<i64: 16, 32>}, {pipeline_mode = #tpu.pipeline_mode<synchronous>, transform_indices = @transform_3, window_bounds = array<i64: 24, 128>}, {pipeline_mode = #tpu.pipeline_mode<synchronous>, transform_indices = @transform_4, window_bounds = array<i64: 32, 128>}, {pipeline_mode = #tpu.pipeline_mode<synchronous>, transform_indices = @transform_5, window_bounds = array<i64: 1, 128>}, {pipeline_mode = #tpu.pipeline_mode<synchronous>, transform_indices = @transform_6, window_bounds = array<i64: 32, 128>}, {pipeline_mode = #tpu.pipeline_mode<synchronous>, transform_indices = @transform_7, window_bounds = array<i64: 32, 128>}, {pipeline_mode = #tpu.pipeline_mode<synchronous>, transform_indices = @transform_8, window_bounds = array<i64: 1, 128>}, {pipeline_mode = #tpu.pipeline_mode<synchronous>, transform_indices = @transform_9, window_bounds = array<i64: 128, 32>}]} {
    %c0 = arith.constant 0 : index
    %c0_0 = arith.constant 0 : index
    %0 = vector.load %arg1[%c0, %c0_0] : memref<128x24xbf16, #tpu.memory_space<vmem>>, vector<128x24xbf16>
    %c0_1 = arith.constant 0 : index
    %c0_2 = arith.constant 0 : index
    %1 = vector.load %arg4[%c0_1, %c0_2] : memref<24x128xbf16, #tpu.memory_space<vmem>>, vector<24x128xbf16>
    %cst = arith.constant dense<0.000000e+00> : vector<128x128xf32>
    %2 = tpu.matmul %0, %1, %cst {dimension_numbers = #tpu.dot_dimension_numbers<[1], [0], [0], [1], [0, 0, 1, 1], [], []>} : vector<128x24xbf16>, vector<24x128xbf16>, vector<128x128xf32> -> vector<128x128xf32>
    %c0_3 = arith.constant 0 : index
    %c0_4 = arith.constant 0 : index
    %3 = vector.load %arg6[%c0_3, %c0_4] : memref<1x128xf32, #tpu.memory_space<vmem>>, vector<1x128xf32>
    %4 = vector.broadcast %3 : vector<1x128xf32> to vector<128x128xf32>
    %5 = arith.addf %2, %4 : vector<128x128xf32>
    %6 = arith.truncf %5 : vector<128x128xf32> to vector<128x128xbf16>
    %c0_5 = arith.constant 0 : index
    %c0_6 = arith.constant 0 : index
    %7 = vector.load %arg11[%c0_5, %c0_6] : memref<128x128xbf16, #tpu.memory_space<vmem>>, vector<128x128xbf16>
    tpu.vector_store %arg11[%c0_5, %c0_6], %6 {strides = array<i32>} : memref<128x128xbf16, #tpu.memory_space<vmem>>, vector<128x128xbf16>,
    %c0_7 = arith.constant 0 : index
    %c0_8 = arith.constant 0 : index
    %8 = vector.load %arg2[%c0_7, %c0_8] : memref<16x32xf32, #tpu.memory_space<vmem>>, vector<16x32xf32>
    %c0_9 = arith.constant 0 : index
    %c0_10 = arith.constant 0 : index
    %9 = vector.load %arg3[%c0_9, %c0_10] : memref<16x32xf32, #tpu.memory_space<vmem>>, vector<16x32xf32>
    %c0_i32 = arith.constant 0 : i32
    %c8_i32 = arith.constant 8 : i32
    %10 = arith.addi %c0_i32, %c8_i32 : i32
    %c1_i32 = arith.constant 1 : i32
    %11:2 = scf.for %arg12 = %c0_i32 to %10 step %c1_i32 iter_args(%arg13 = %8, %arg14 = %9) -> (vector<16x32xf32>, vector<16x32xf32>)  : i32 {
      %c16_i32 = arith.constant 16 : i32
      %24 = arith.muli %arg12, %c16_i32 : i32
      %25 = tpu.assume_multiple %24, 16 : i32
      %26 = arith.truncf %arg13 : vector<16x32xf32> to vector<16x32xbf16>
      %c0_29 = arith.constant 0 : index
      %c0_30 = arith.constant 0 : index
      %27 = vector.load %arg5[%c0_29, %c0_30] : memref<32x128xbf16, #tpu.memory_space<vmem>>, vector<32x128xbf16>
      %cst_31 = arith.constant dense<0.000000e+00> : vector<16x128xf32>
      %28 = tpu.matmul %26, %27, %cst_31 {dimension_numbers = #tpu.dot_dimension_numbers<[1], [0], [0], [1], [0, 0, 1, 1], [], []>} : vector<16x32xbf16>, vector<32x128xbf16>, vector<16x128xf32> -> vector<16x128xf32>
      %29 = arith.index_cast %25 : i32 to index
      %c0_32 = arith.constant 0 : index
      %30 = vector.load %arg11[%29, %c0_32] : memref<128x128xbf16, #tpu.memory_space<vmem>>, vector<16x128xbf16>
      %31 = arith.extf %30 : vector<16x128xbf16> to vector<16x128xf32>
      %32 = arith.addf %31, %28 : vector<16x128xf32>
      %33 = vector.extract_strided_slice %32 {offsets = [0, 0], sizes = [16, 32], strides = [1, 1]} : vector<16x128xf32> to vector<16x32xf32>
      %34 = vector.extract_strided_slice %32 {offsets = [0, 32], sizes = [16, 32], strides = [1, 1]} : vector<16x128xf32> to vector<16x32xf32>
      %35 = vector.extract_strided_slice %32 {offsets = [0, 64], sizes = [16, 32], strides = [1, 1]} : vector<16x128xf32> to vector<16x32xf32>
      %36 = vector.extract_strided_slice %32 {offsets = [0, 96], sizes = [16, 32], strides = [1, 1]} : vector<16x128xf32> to vector<16x32xf32>
      %cst_33 = arith.constant 5.000000e-01 : f32
      %37 = vector.broadcast %cst_33 : f32 to vector<16x32xf32>
      %38 = arith.mulf %37, %33 : vector<16x32xf32>
      %39 = math.tanh %38 : vector<16x32xf32>
      %cst_34 = arith.constant 1.000000e+00 : f32
      %40 = vector.broadcast %cst_34 : f32 to vector<16x32xf32>
      %41 = arith.addf %39, %40 : vector<16x32xf32>
      %cst_35 = arith.constant 5.000000e-01 : f32
      %42 = vector.broadcast %cst_35 : f32 to vector<16x32xf32>
      %43 = arith.mulf %42, %41 : vector<16x32xf32>
      %cst_36 = arith.constant 5.000000e-01 : f32
      %44 = vector.broadcast %cst_36 : f32 to vector<16x32xf32>
      %45 = arith.mulf %44, %34 : vector<16x32xf32>
      %46 = math.tanh %45 : vector<16x32xf32>
      %cst_37 = arith.constant 1.000000e+00 : f32
      %47 = vector.broadcast %cst_37 : f32 to vector<16x32xf32>
      %48 = arith.addf %46, %47 : vector<16x32xf32>
      %cst_38 = arith.constant 5.000000e-01 : f32
      %49 = vector.broadcast %cst_38 : f32 to vector<16x32xf32>
      %50 = arith.mulf %49, %48 : vector<16x32xf32>
      %cst_39 = arith.constant 5.000000e-01 : f32
      %51 = vector.broadcast %cst_39 : f32 to vector<16x32xf32>
      %52 = arith.mulf %51, %36 : vector<16x32xf32>
      %53 = math.tanh %52 : vector<16x32xf32>
      %cst_40 = arith.constant 1.000000e+00 : f32
      %54 = vector.broadcast %cst_40 : f32 to vector<16x32xf32>
      %55 = arith.addf %53, %54 : vector<16x32xf32>
      %cst_41 = arith.constant 5.000000e-01 : f32
      %56 = vector.broadcast %cst_41 : f32 to vector<16x32xf32>
      %57 = arith.mulf %56, %55 : vector<16x32xf32>
      %58 = math.tanh %35 : vector<16x32xf32>
      %59 = arith.mulf %50, %arg14 : vector<16x32xf32>
      %60 = arith.mulf %43, %58 : vector<16x32xf32>
      %61 = arith.addf %59, %60 : vector<16x32xf32>
      %62 = math.tanh %61 : vector<16x32xf32>
      %63 = arith.mulf %57, %62 : vector<16x32xf32>
      %64 = arith.truncf %63 : vector<16x32xf32> to vector<16x32xbf16>
      %65 = arith.index_cast %25 : i32 to index
      %c0_42 = arith.constant 0 : index
      %66 = vector.load %arg10[%65, %c0_42] : memref<128x32xbf16, #tpu.memory_space<vmem>>, vector<16x32xbf16>
      tpu.vector_store %arg10[%65, %c0_42], %64 {strides = array<i32>} : memref<128x32xbf16, #tpu.memory_space<vmem>>, vector<16x32xbf16>,
      scf.yield %63, %61 : vector<16x32xf32>, vector<16x32xf32>
    }
    %c8_i32_11 = arith.constant 8 : i32
    %c0_12 = arith.constant 0 : index
    %c0_13 = arith.constant 0 : index
    %12 = vector.load %arg10[%c0_12, %c0_13] : memref<128x32xbf16, #tpu.memory_space<vmem>>, vector<128x32xbf16>
    %c0_14 = arith.constant 0 : index
    %c0_15 = arith.constant 0 : index
    %13 = vector.load %arg7[%c0_14, %c0_15] : memref<32x128xbf16, #tpu.memory_space<vmem>>, vector<32x128xbf16>
    %cst_16 = arith.constant dense<0.000000e+00> : vector<128x128xf32>
    %14 = tpu.matmul %12, %13, %cst_16 {dimension_numbers = #tpu.dot_dimension_numbers<[1], [0], [0], [1], [0, 0, 1, 1], [], []>} : vector<128x32xbf16>, vector<32x128xbf16>, vector<128x128xf32> -> vector<128x128xf32>
    %c0_17 = arith.constant 0 : index
    %c0_18 = arith.constant 0 : index
    %15 = vector.load %arg9[%c0_17, %c0_18] : memref<1x128xf32, #tpu.memory_space<vmem>>, vector<1x128xf32>
    %16 = vector.broadcast %15 : vector<1x128xf32> to vector<128x128xf32>
    %17 = arith.addf %14, %16 : vector<128x128xf32>
    %18 = arith.truncf %17 : vector<128x128xf32> to vector<128x128xbf16>
    %c0_19 = arith.constant 0 : index
    %c0_20 = arith.constant 0 : index
    %19 = vector.load %arg11[%c0_19, %c0_20] : memref<128x128xbf16, #tpu.memory_space<vmem>>, vector<128x128xbf16>
    tpu.vector_store %arg11[%c0_19, %c0_20], %18 {strides = array<i32>} : memref<128x128xbf16, #tpu.memory_space<vmem>>, vector<128x128xbf16>,
    %c0_21 = arith.constant 0 : index
    %c0_22 = arith.constant 0 : index
    %20 = vector.load %arg2[%c0_21, %c0_22] : memref<16x32xf32, #tpu.memory_space<vmem>>, vector<16x32xf32>
    %c0_23 = arith.constant 0 : index
    %c0_24 = arith.constant 0 : index
    %21 = vector.load %arg3[%c0_23, %c0_24] : memref<16x32xf32, #tpu.memory_space<vmem>>, vector<16x32xf32>
    %c0_i32_25 = arith.constant 0 : i32
    %c8_i32_26 = arith.constant 8 : i32
    %22 = arith.addi %c0_i32_25, %c8_i32_26 : i32
    %c1_i32_27 = arith.constant 1 : i32
    %23:2 = scf.for %arg12 = %c0_i32_25 to %22 step %c1_i32_27 iter_args(%arg13 = %20, %arg14 = %21) -> (vector<16x32xf32>, vector<16x32xf32>)  : i32 {
      %c16_i32 = arith.constant 16 : i32
      %24 = arith.muli %arg12, %c16_i32 : i32
      %25 = tpu.assume_multiple %24, 16 : i32
      %26 = arith.truncf %arg13 : vector<16x32xf32> to vector<16x32xbf16>
      %c0_29 = arith.constant 0 : index
      %c0_30 = arith.constant 0 : index
      %27 = vector.load %arg8[%c0_29, %c0_30] : memref<32x128xbf16, #tpu.memory_space<vmem>>, vector<32x128xbf16>
      %cst_31 = arith.constant dense<0.000000e+00> : vector<16x128xf32>
      %28 = tpu.matmul %26, %27, %cst_31 {dimension_numbers = #tpu.dot_dimension_numbers<[1], [0], [0], [1], [0, 0, 1, 1], [], []>} : vector<16x32xbf16>, vector<32x128xbf16>, vector<16x128xf32> -> vector<16x128xf32>
      %29 = arith.index_cast %25 : i32 to index
      %c0_32 = arith.constant 0 : index
      %30 = vector.load %arg11[%29, %c0_32] : memref<128x128xbf16, #tpu.memory_space<vmem>>, vector<16x128xbf16>
      %31 = arith.extf %30 : vector<16x128xbf16> to vector<16x128xf32>
      %32 = arith.addf %31, %28 : vector<16x128xf32>
      %33 = vector.extract_strided_slice %32 {offsets = [0, 0], sizes = [16, 32], strides = [1, 1]} : vector<16x128xf32> to vector<16x32xf32>
      %34 = vector.extract_strided_slice %32 {offsets = [0, 32], sizes = [16, 32], strides = [1, 1]} : vector<16x128xf32> to vector<16x32xf32>
      %35 = vector.extract_strided_slice %32 {offsets = [0, 64], sizes = [16, 32], strides = [1, 1]} : vector<16x128xf32> to vector<16x32xf32>
      %36 = vector.extract_strided_slice %32 {offsets = [0, 96], sizes = [16, 32], strides = [1, 1]} : vector<16x128xf32> to vector<16x32xf32>
      %cst_33 = arith.constant 5.000000e-01 : f32
      %37 = vector.broadcast %cst_33 : f32 to vector<16x32xf32>
      %38 = arith.mulf %37, %33 : vector<16x32xf32>
      %39 = math.tanh %38 : vector<16x32xf32>
      %cst_34 = arith.constant 1.000000e+00 : f32
      %40 = vector.broadcast %cst_34 : f32 to vector<16x32xf32>
      %41 = arith.addf %39, %40 : vector<16x32xf32>
      %cst_35 = arith.constant 5.000000e-01 : f32
      %42 = vector.broadcast %cst_35 : f32 to vector<16x32xf32>
      %43 = arith.mulf %42, %41 : vector<16x32xf32>
      %cst_36 = arith.constant 5.000000e-01 : f32
      %44 = vector.broadcast %cst_36 : f32 to vector<16x32xf32>
      %45 = arith.mulf %44, %34 : vector<16x32xf32>
      %46 = math.tanh %45 : vector<16x32xf32>
      %cst_37 = arith.constant 1.000000e+00 : f32
      %47 = vector.broadcast %cst_37 : f32 to vector<16x32xf32>
      %48 = arith.addf %46, %47 : vector<16x32xf32>
      %cst_38 = arith.constant 5.000000e-01 : f32
      %49 = vector.broadcast %cst_38 : f32 to vector<16x32xf32>
      %50 = arith.mulf %49, %48 : vector<16x32xf32>
      %cst_39 = arith.constant 5.000000e-01 : f32
      %51 = vector.broadcast %cst_39 : f32 to vector<16x32xf32>
      %52 = arith.mulf %51, %36 : vector<16x32xf32>
      %53 = math.tanh %52 : vector<16x32xf32>
      %cst_40 = arith.constant 1.000000e+00 : f32
      %54 = vector.broadcast %cst_40 : f32 to vector<16x32xf32>
      %55 = arith.addf %53, %54 : vector<16x32xf32>
      %cst_41 = arith.constant 5.000000e-01 : f32
      %56 = vector.broadcast %cst_41 : f32 to vector<16x32xf32>
      %57 = arith.mulf %56, %55 : vector<16x32xf32>
      %58 = math.tanh %35 : vector<16x32xf32>
      %59 = arith.mulf %50, %arg14 : vector<16x32xf32>
      %60 = arith.mulf %43, %58 : vector<16x32xf32>
      %61 = arith.addf %59, %60 : vector<16x32xf32>
      %62 = math.tanh %61 : vector<16x32xf32>
      %63 = arith.mulf %57, %62 : vector<16x32xf32>
      %64 = arith.truncf %63 : vector<16x32xf32> to vector<16x32xbf16>
      %65 = arith.index_cast %25 : i32 to index
      %c0_42 = arith.constant 0 : index
      %66 = vector.load %arg10[%65, %c0_42] : memref<128x32xbf16, #tpu.memory_space<vmem>>, vector<16x32xbf16>
      tpu.vector_store %arg10[%65, %c0_42], %64 {strides = array<i32>} : memref<128x32xbf16, #tpu.memory_space<vmem>>, vector<16x32xbf16>,
      scf.yield %63, %61 : vector<16x32xf32>, vector<16x32xf32>
    }
    %c8_i32_28 = arith.constant 8 : i32
    return
  }
  func.func @transform_0(%arg0: i32) -> (i32, i32) {
    %c0_i32 = arith.constant 0 : i32
    %c0_i32_0 = arith.constant 0 : i32
    %c0_i32_1 = arith.constant 0 : i32
    return %c0_i32, %c0_i32_0 : i32, i32
  }
  func.func @transform_1(%arg0: i32) -> (i32, i32) {
    %c0_i32 = arith.constant 0 : i32
    %c0_i32_0 = arith.constant 0 : i32
    %c0_i32_1 = arith.constant 0 : i32
    return %c0_i32, %c0_i32_0 : i32, i32
  }
  func.func @transform_2(%arg0: i32) -> (i32, i32) {
    %c0_i32 = arith.constant 0 : i32
    %c0_i32_0 = arith.constant 0 : i32
    %c0_i32_1 = arith.constant 0 : i32
    return %c0_i32, %c0_i32_0 : i32, i32
  }
  func.func @transform_3(%arg0: i32) -> (i32, i32) {
    %c0_i32 = arith.constant 0 : i32
    %c0_i32_0 = arith.constant 0 : i32
    %c0_i32_1 = arith.constant 0 : i32
    return %c0_i32, %c0_i32_0 : i32, i32
  }
  func.func @transform_4(%arg0: i32) -> (i32, i32) {
    %c0_i32 = arith.constant 0 : i32
    %c0_i32_0 = arith.constant 0 : i32
    %c0_i32_1 = arith.constant 0 : i32
    return %c0_i32, %c0_i32_0 : i32, i32
  }
  func.func @transform_5(%arg0: i32) -> (i32, i32) {
    %c0_i32 = arith.constant 0 : i32
    %c0_i32_0 = arith.constant 0 : i32
    %c0_i32_1 = arith.constant 0 : i32
    return %c0_i32, %c0_i32_0 : i32, i32
  }
  func.func @transform_6(%arg0: i32) -> (i32, i32) {
    %c0_i32 = arith.constant 0 : i32
    %c0_i32_0 = arith.constant 0 : i32
    %c0_i32_1 = arith.constant 0 : i32
    return %c0_i32, %c0_i32_0 : i32, i32
  }
  func.func @transform_7(%arg0: i32) -> (i32, i32) {
    %c0_i32 = arith.constant 0 : i32
    %c0_i32_0 = arith.constant 0 : i32
    %c0_i32_1 = arith.constant 0 : i32
    return %c0_i32, %c0_i32_0 : i32, i32
  }
  func.func @transform_8(%arg0: i32) -> (i32, i32) {
    %c0_i32 = arith.constant 0 : i32
    %c0_i32_0 = arith.constant 0 : i32
    %c0_i32_1 = arith.constant 0 : i32
    return %c0_i32, %c0_i32_0 : i32, i32
  }
  func.func @transform_9(%arg0: i32) -> (i32, i32) {
    %c0_i32 = arith.constant 0 : i32
    %c0_i32_0 = arith.constant 0 : i32
    %c0_i32_1 = arith.constant 0 : i32
    return %c0_i32, %c0_i32_0 : i32, i32
  }
}

</mosaic_0001>

<bundles_post_ra>
// kernel: tpu_custom_call.1
= control target key start
LH: loop header
LB: loop body
LE: loop exit
PB: predicated region body
PF: predicated region fallthrough
CT: control target
= control target key end

     0   :  { %14 = vsyncpa [#allocation4], 0  ;;  %s1268_s30 = smov [#allocation3]   ;;  %s1569_s0 = inlined_call_operand.vmem [shape: bf16[128,24], index: 0, kind: input, shape index: {}]   ;;  %s1570_s1 = inlined_call_operand.vmem [shape: f32[16,32], index: 1, kind: input, shape index: {}]   ;;  %s1571_s2 = inlined_call_operand.vmem [shape: f32[16,32], index: 2, kind: input, shape index: {}]   ;;  %s1572_s3 = inlined_call_operand.hbm [shape: bf16[24,128], index: 3, kind: input, shape index: {}]   ;;  %s1573_s4 = inlined_call_operand.vmem [shape: bf16[32,128], index: 4, kind: input, shape index: {}]   ;;  %s1574_s5 = inlined_call_operand.vmem [shape: f32[1,128], index: 5, kind: input, shape index: {}]   ;;  %s1575_s6 = inlined_call_operand.vmem [shape: bf16[32,128], index: 6, kind: input, shape index: {}]   ;;  %s1576_s7 = inlined_call_operand.vmem [shape: bf16[32,128], index: 7, kind: input, shape index: {}]   ;;  %s1577_s8 = inlined_call_operand.vmem [shape: f32[1,128], index: 8, kind: input, shape index: {}]   ;;  %s1578_s9 = inlined_call_operand.vmem [shape: bf16[128,32], index: 9, kind: output, shape index: {}]  }
   0x1   :  { %s26_s10 = sshll.u32 %s1268_s30, 4  ;;  %s1164_s13 = scalar_lea.hbm %s1572_s3, 192  ;;  %s27_s10 = int_to_ptr.vmem [resolvable:$true] %s26_s10 }
   0x2   :  { %p1165_p0 = scmp.ne.s32.totalorder %s1572_s3, %s1164_s13  ;;  %p1168_p1 = scmp.lt.u32.totalorder %s1164_s13, %s1572_s3 }
   0x4   :  { %p1170_p2 = pnand %p1168_p1, %p1165_p0 }
   0x6   :  { %1173 = shalt.err (!%p1170_p2)
}
   0x7   :  { %s1174_s18 = scalar_lea.vmem %s27_s10, 192  ;;  %p1179_p4 = scmp.lt.s32.totalorder %s27_s10, %s27_s10 }
   0x8   :  { %p1175_p3 = scmp.ne.s32.totalorder %s27_s10, %s1174_s18  ;;  %p1180_p5 = scmp.lt.s32.totalorder %s1174_s18, %s1174_s18 }
   0xa   :  { %p1181_p6 = por %p1180_p5, %p1179_p4 }
   0xc   :  { %p1182_p7 = pnand %p1181_p6, %p1175_p3 }
   0xe   :  { %1185 = shalt.err (!%p1182_p7)
}
   0xf   :  { %s1269_s19 = smov 64   ;;  %s1270_s20 = smov 4  }
  0x10   :  { %32 = dma.hbm_to_vmem [thread:$0]  %s1572_s3, 192, %s27_s10, [#allocation4], %s1269_s19, %s1269_s19, %s1270_s20  }
  0x11   :  { %1226 = dma.done.wait [#allocation4], 192  }
  0x12   :  { %1227 = vsyncadd [#allocation4], 4294967104  ;;  %v1346_v0 = vld [vmem:[%s1570_s1] sm:$0xff]   ;;  %v1351_v1 = vld [vmem:[%s1570_s1 + $0x8] sm:$0xff]   ;;  %vm147_vm0 = vcmask 1043456   ;;  %vm122_vm1 = vcmask 195584  }
  0x13   :  { %v1356_v2 = vld [vmem:[%s1571_s2] sm:$0xff]   ;;  %v1361_v3 = vld [vmem:[%s1571_s2 + $0x8] sm:$0xff]   ;;  %v1116_v4 = vld [vmem:[#allocation3] sm:$0xff]  }
  0x14   :  { %v1117_v5 = vld [vmem:[#allocation3 + $0x8] ss:$0 sps:$4 sm:$0xff]   ;;  %v1118_v6 = vld [vmem:[%s1569_s0] sm:$0xff]   ;;  %957 = vmatprep.subr.bf16.mxu0 %v1116_v4  ;;  %1013 = vmatprep.subr.bf16.mxu1 %v1116_v4  ;;  %v1120_v9 = vld [vmem:[%s1569_s0 + $0x8] sm:$0xff]  }
  0x15   :  { %v1119_v7 = vld [vmem:[%s1569_s0 + $0x20] sm:$0xff]   ;;  %958 = vmatpush3.bf16.msra.mxu0 %v1116_v4  ;;  %1015 = vmatpush3.bf16.msra.mxu1 %v1116_v4  ;;  %v149_v8 = vsel %vm147_vm0, %v1117_v5, 0  ;;  %v1121_v10 = vld [vmem:[%s1569_s0 + $0x28] sm:$0xff]   ;;  %v1122_v11 = vld [vmem:[%s1569_s0 + $0x10] sm:$0xff]  }
  0x16   :  { %1021 = vmatprep.subr.msk.bf16.mxu0 %vm147_vm0, %v1117_v5  ;;  %1022 = vmatprep.subr.msk.bf16.mxu1 %vm147_vm0, %v1117_v5  ;;  %v1123_v12 = vld [vmem:[%s1569_s0 + $0x30] sm:$0xff]   ;;  %v1124_v13 = vld [vmem:[%s1569_s0 + $0x18] sm:$0xff]   ;;  %v873_v16 = vld [vmem:[%s1574_s5] ss:$0 sm:$0xff] }
  0x17   :  { %961 = vmatprep.mubr.msk.bf16.mxu0 %vm122_vm1, %v1118_v6  ;;  %969 = vmatprep.mubr.msk.bf16.mxu1 %vm122_vm1, %v1119_v7  ;;  %v1125_v14 = vld [vmem:[%s1569_s0 + $0x38] sm:$0xff]   ;;  %s1410_s0 = smov 0  }
  0x19   :  { %960 = vmatpush3.bf16.msra.mxu0 %v149_v8  ;;  %1016 = vmatpush3.bf16.msra.mxu1 %v149_v8 }
  0x1c   :  { %962 = vmatmul.mubr.msk.bf16.vlgmr.msra.gmra.mrb[0].mxu0 %vm122_vm1, %v1120_v9  ;;  %970 = vmatmul.mubr.msk.bf16.vlgmr.msra.gmra.mrb[0].mxu1 %vm122_vm1, %v1121_v10 }
  0x1d   :  { %965 = vmatprep.mubr.msk.bf16.mxu0 %vm122_vm1, %v1122_v11  ;;  %973 = vmatprep.mubr.msk.bf16.mxu1 %vm122_vm1, %v1123_v12 }
  0x24   :  { %966 = vmatmul.mubr.msk.bf16.gmra.mrb[4].mxu0 %vm122_vm1, %v1124_v13  ;;  %974 = vmatmul.mubr.msk.bf16.gmra.mrb[4].mxu1 %vm122_vm1, %v1125_v14 }
  0xef   :  { %v963_v15 = vpop.f32.mrb[0].mxu0  ;;  %v971_v17 = vpop.f32.mrb[0].mxu1 }
  0xf0   :  { %v185_v18 = vpop.f32.mrb[1].mxu0  ;;  %v217_v19 = vpop.f32.mrb[1].mxu1  ;;  %v194_v22 = vadd.f32 %v963_v15, %v873_v16  ;;  %v226_v23 = vadd.f32 %v971_v17, %v873_v16 }
  0xf1   :  { %v964_v20 = vpop.f32.mrb[2].mxu0  ;;  %v972_v21 = vpop.f32.mrb[2].mxu1  ;;  %v186_v28 = vadd.f32 %v873_v16, %v185_v18  ;;  %v218_v29 = vadd.f32 %v873_v16, %v217_v19 }
  0xf2   :  { %v197_v24 = vadd.f32 %v964_v20, %v873_v16  ;;  %v229_v25 = vadd.f32 %v972_v21, %v873_v16  ;;  %v188_v26 = vpop.f32.mrb[3].mxu0  ;;  %v220_v27 = vpop.f32.mrb[3].mxu1 }
  0xf3   :  { %v189_v30 = vadd.f32 %v873_v16, %v188_v26  ;;  %v221_v31 = vadd.f32 %v873_v16, %v220_v27 }
  0xf4   :  { %v249_v32 = vpack.c.bf16 %v197_v24, %v194_v22  ;;  %v253_v33 = vpack.c.bf16 %v229_v25, %v226_v23 }
  0xf5   :  { %v248_v34 = vpack.c.bf16 %v189_v30, %v186_v28  ;;  %v252_v35 = vpack.c.bf16 %v221_v31, %v218_v29 }
  0xf6   :  { %257 = vst [vmem:[#allocation2 + $0x8] sm:$0xff] %v249_v32  ;;  %261 = vst [vmem:[#allocation2 + $0x28] sm:$0xff] %v253_v33 }
  0xf7   :  { %256 = vst [vmem:[#allocation2] sm:$0xff] %v248_v34  ;;  %260 = vst [vmem:[#allocation2 + $0x20] sm:$0xff] %v252_v35  ;;  %v967_v36 = vpop.f32.mrb[4].mxu0  ;;  %v975_v37 = vpop.f32.mrb[4].mxu1 }
  0xf8   :  { %v201_v38 = vpop.f32.mrb[5].mxu0  ;;  %v233_v39 = vpop.f32.mrb[5].mxu1  ;;  %v210_v42 = vadd.f32 %v967_v36, %v873_v16  ;;  %v242_v43 = vadd.f32 %v975_v37, %v873_v16 }
  0xf9   :  { %v968_v40 = vpop.f32.mrb[6].mxu0  ;;  %v976_v41 = vpop.f32.mrb[6].mxu1  ;;  %v202_v48 = vadd.f32 %v873_v16, %v201_v38  ;;  %v234_v49 = vadd.f32 %v873_v16, %v233_v39 }
  0xfa   :  { %v213_v44 = vadd.f32 %v968_v40, %v873_v16  ;;  %v245_v45 = vadd.f32 %v976_v41, %v873_v16  ;;  %v204_v46 = vpop.f32.mrb[7].mxu0  ;;  %v236_v47 = vpop.f32.mrb[7].mxu1 }
  0xfb   :  { %v205_v50 = vadd.f32 %v873_v16, %v204_v46  ;;  %v237_v51 = vadd.f32 %v873_v16, %v236_v47 }
  0xfc   :  { %v251_v52 = vpack.c.bf16 %v213_v44, %v210_v42  ;;  %v255_v53 = vpack.c.bf16 %v245_v45, %v242_v43 }
  0xfd   :  { %v250_v54 = vpack.c.bf16 %v205_v50, %v202_v48  ;;  %v254_v55 = vpack.c.bf16 %v237_v51, %v234_v49 }
  0xfe   :  { %259 = vst [vmem:[#allocation2 + $0x18] sm:$0xff] %v251_v52  ;;  %263 = vst [vmem:[#allocation2 + $0x38] sm:$0xff] %v255_v53 }
  0xff   :  { %258 = vst [vmem:[#allocation2 + $0x10] sm:$0xff] %v250_v54  ;;  %262 = vst [vmem:[#allocation2 + $0x30] sm:$0xff] %v254_v55 }
 0x100 LB: > { %v1126_v56 = vld [vmem:[%s1573_s4] sm:$0xff]   ;;  %v1271_v57 = vmov 0.0   ;;  %v1127_v58 = vld [vmem:[%s1573_s4 + $0x8] sm:$0xff]   ;;  %vm1272_vm2 = vmmov 0   ;;  %s1273_s30 = smov 32   ;;  %v279_v59 = vpack.c.bf16 %v1238_v1, %v1242_v0  ;;  %vm296_vm3 = vcmask 261120   ;;  %s1246_s0 = sphi %s1410_s0, %s273_s0   ;;  %v1242_v0 = vphi %v1346_v0, %v424_v0   ;;  %v1238_v1 = vphi %v1351_v1, %v426_v1   ;;  %v1234_v2 = vphi %v1356_v2, %v432_v2   ;;  %v1230_v3 = vphi %v1361_v3, %v434_v3  }
 0x101   : > { %977 = vmatprep.subr.bf16.mxu0 %v1271_v57  ;;  %981 = vmatprep.mubr.msk.bf16.mxu0 %vm1272_vm2, %v1271_v57  ;;  %s892_s3 = sshll.u32 %s1246_s0, 4  ;;  %s1274_s13 = smov 64   ;;  %vm418_vm4 = vcmask 257024  }
 0x102   : > { %978 = vmatpush3.bf16.msra.mxu0 %v1126_v56  ;;  %362 = vrot.lane.b32.xlu1 %v1234_v2, %s1273_s30  ;;  %s341_s10 = sshra.s32 %s892_s3, 4  ;;  %s1275_s14 = smov 96  }
 0x103   : > { %979 = vmatprep.subr.bf16.mxu0 %v1271_v57  ;;  %s896_s11 = sshll.u32 %s341_s10, 3  ;;  %s414_s15 = sshra.s32 %s892_s3, 3 }
 0x104   : > { %s344_s12 = scalar_lea.vmem [#allocation2], %s896_s11  ;;  %s899_s16 = sshll.u32 %s414_s15, 2 }
 0x105   : > { %s417_s19 = scalar_lea.vmem %s1578_s9, %s899_s16  ;;  %s273_s0 = sadd.s32 1, %s1246_s0  }
 0x106   : > { %980 = vmatpush3.bf16.msra.mxu0 %v1127_v58  ;;  %364 = vrot.lane.b32.xlu1 %v1230_v3, %s1273_s30  ;;  %v345_v60 = vld [vmem:[%s344_s12] sm:$0xff]  ;;  %p270_p8 = scmp.ge.s32.totalorder %s273_s0, 8  }
 0x107   : > { %v346_v61 = vunpack.c.l.bf16 %v345_v60  ;;  %v347_v62 = vunpack.c.h.bf16 %v345_v60  ;;  %v1140_v37 = vld [vmem:[%s1575_s6] sm:$0xff] (%p270_p8)   ;;  %v1141_v38 = vld [vmem:[%s1575_s6 + $0x8] sm:$0xff] (%p270_p8)  }
 0x108   :  { %985 = vmatprep.subr.bf16.mxu0 (%p270_p8), %v1140_v37  ;;  %1017 = vmatprep.subr.bf16.mxu1 (%p270_p8), %v1140_v37  ;;  %v654_v47 = vld [vmem:[%s1570_s1] sm:$0xff] (%p270_p8)   ;;  %v655_v48 = vld [vmem:[%s1570_s1 + $0x8] sm:$0xff] (%p270_p8)   ;;  %s1520_s1 = smov (%p270_p8), 0  }
 0x109   : > { %982 = vmatmul.mubr.msk.bf16.vlgmr.msra.gmra.mrb[0].mxu0 %vm296_vm3, %v279_v59  ;;  %1019 = vmatpush3.bf16.msra.mxu1 (%p270_p8), %v1140_v37  ;;  %v656_v49 = vld [vmem:[%s1571_s2] sm:$0xff] (%p270_p8)   ;;  %v657_v50 = vld [vmem:[%s1571_s2 + $0x8] sm:$0xff] (%p270_p8)  }
 0x10a   :  { %986 = vmatpush3.bf16.msra.mxu0 (%p270_p8), %v1140_v37  ;;  %1018 = vmatprep.subr.bf16.mxu1 (%p270_p8), %v1141_v38  ;;  %v900_v52 = vld [vmem:[%s1577_s8] ss:$0 sm:$0xff] (%p270_p8) }
 0x10b   :  { %987 = vmatprep.subr.bf16.mxu0 (%p270_p8), %v1141_v38 }
 0x10d   :  { %1020 = vmatpush3.bf16.msra.mxu1 (%p270_p8), %v1141_v38 }
 0x10e   :  { %988 = vmatpush3.bf16.msra.mxu0 (%p270_p8), %v1141_v38 }
 0x174   : > { %v363_v19 = vpop.permute.xlu1 %362 }
 0x178   : > { %v365_v21 = vpop.permute.xlu1 %364 }
 0x1dc   : > { %v334_v63 = vpop.f32.mrb[0].mxu0 }
 0x1dd   : > { %v348_v4 = vadd.f32 %v346_v61, %v334_v63  ;;  %v983_v5 = vpop.f32.mrb[1].mxu0 }
 0x1de   : > { %v337_v6 = vpop.f32.mrb[2].mxu0 }
 0x1df   : > { %1128 = vtanh.f32 %v348_v4  ;;  %v349_v0 = vadd.f32 %v347_v62, %v337_v6  ;;  %v984_v1 = vpop.f32.mrb[3].mxu0  ;;  %v350_v7 = vmul.f32 0.5, %v348_v4 }
 0x1e1   : > { %1130 = vtanh.f32 %v349_v0  ;;  %v351_v8 = vmul.f32 0.5, %v349_v0 }
 0x1e2   : > { %1132 = vtanh.f32 %v350_v7 }
 0x1e3   : > { %1134 = vtanh.f32 %v351_v8 }
 0x1e9   : > { %v1129_v2 = vpop.eup %1128 }
 0x1ea   : > { %372 = vrot.lane.b32.xlu0 %v1129_v2, %s1274_s13 }
 0x1eb   : > { %v1131_v3 = vpop.eup %1130 }
 0x1ec   : > { %v1133_v9 = vpop.eup %1132 }
 0x1ed   : > { %v354_v10 = vadd.f32 1.0, %v1133_v9  ;;  %v1135_v11 = vpop.eup %1134 }
 0x1ee   : > { %374 = vrot.lane.b32.xlu0 %v1131_v3, %s1274_s13  ;;  %v355_v13 = vadd.f32 1.0, %v1135_v11 }
 0x1ef   : > { %v356_v12 = vmul.f32 0.5, %v354_v10 }
 0x1f0   : > { %v357_v16 = vmul.f32 0.5, %v355_v13 }
 0x1f1   : > { %v368_v20 = vmul.f32 %v363_v19, %v356_v12 }
 0x1f2   : > { %v369_v24 = vmul.f32 %v365_v21, %v357_v16 }
 0x25c   : > { %v373_v14 = vpop.permute.xlu0 %372 }
 0x25d   : > { %v378_v15 = vmul.f32 %v373_v14, %v356_v12 }
 0x25f   : > { %382 = vrot.lane.b32.xlu0 %v378_v15, %s1273_s30 }
 0x260   : > { %v375_v17 = vpop.permute.xlu0 %374 }
 0x261   : > { %v379_v18 = vmul.f32 %v375_v17, %v357_v16 }
 0x263   : > { %384 = vrot.lane.b32.xlu1 %v379_v18, %s1273_s30 }
 0x2d1   : > { %v383_v22 = vpop.permute.xlu0 %382 }
 0x2d2   : > { %v388_v23 = vadd.f32 %v383_v22, %v368_v20 }
 0x2d4   : > { %1136 = vtanh.f32 %v388_v23 }
 0x2d5   : > { %v385_v25 = vpop.permute.xlu1 %384 }
 0x2d6   : > { %v389_v26 = vadd.f32 %v385_v25, %v369_v24 }
 0x2d8   : > { %1138 = vtanh.f32 %v389_v26 }
 0x2de   : > { %v1137_v27 = vpop.eup %1136 }
 0x2df   : > { %394 = vrot.lane.b32.xlu0 %v1137_v27, %s1274_s13 }
 0x2e2   : > { %v1139_v28 = vpop.eup %1138 }
 0x2e3   : > { %396 = vrot.lane.b32.xlu1 %v1139_v28, %s1274_s13 }
 0x351   : > { %v395_v29 = vpop.permute.xlu0 %394 }
 0x352   : > { %v400_v30 = vmul.f32 %v395_v29, %v356_v12 }
 0x354   : > { %423 = vrot.lane.b32.xlu0 %v400_v30, %s1273_s30  ;;  %v927_v32 = vpack.c.bf16 %v400_v30, %v400_v30 }
 0x355   : > { %v397_v31 = vpop.permute.xlu1 %396 }
 0x356   : > { %v401_v33 = vmul.f32 %v397_v31, %v357_v16 }
 0x358   : > { %408 = vrot.lane.b32.xlu0 %v927_v32, %s1273_s30  ;;  %425 = vrot.lane.b32.xlu1 %v401_v33, %s1273_s30  ;;  %v928_v34 = vpack.c.bf16 %v401_v33, %v401_v33 }
 0x35c   : > { %431 = vrot.lane.b32.xlu0 %v388_v23, %s1275_s14  ;;  %410 = vrot.lane.b32.xlu1 %v928_v34, %s1273_s30 }
 0x360   : > { %433 = vrot.lane.b32.xlu1 %v389_v26, %s1275_s14 }
 0x3c6   : > { %v424_v0 = vpop.permute.xlu0 %423  }
 0x3ca   : > { %v409_v35 = vpop.permute.xlu0 %408  ;;  %v426_v1 = vpop.permute.xlu1 %425  }
 0x3cb   : > { %419 = vst.msk [vmem:[%s417_s19] sm:$0xf] %vm418_vm4, %v409_v35 }
 0x3cc   :  { %272 = sbr.rel (!%p270_p8) target bundleno = 256 (0x100), region = 78 }
 0x3ce   : > { %v432_v2 = vpop.permute.xlu0 %431   ;;  %v411_v36 = vpop.permute.xlu1 %410 }
 0x3cf   : > { %420 = vst.msk [vmem:[%s417_s19 + $0x4] sm:$0xf] %vm418_vm4, %v411_v36 }
 0x3d2   : > { %v434_v3 = vpop.permute.xlu1 %433  }
 0x3d6   :  { %v1142_v39 = vld [vmem:[%s1578_s9] sm:$0xff]   ;;  %v1144_v41 = vld [vmem:[%s1578_s9 + $0x8] sm:$0xff]   ;;  %v1146_v43 = vld [vmem:[%s1578_s9 + $0x10] sm:$0xff]  }
 0x3d7   :  { %v1143_v40 = vld [vmem:[%s1578_s9 + $0x20] sm:$0xff]   ;;  %989 = vmatprep.mubr.msk.bf16.mxu0 %vm296_vm3, %v1142_v39  ;;  %v1145_v42 = vld [vmem:[%s1578_s9 + $0x28] sm:$0xff]   ;;  %v1147_v44 = vld [vmem:[%s1578_s9 + $0x30] sm:$0xff]  }
 0x3d8   :  { %997 = vmatprep.mubr.msk.bf16.mxu1 %vm296_vm3, %v1143_v40  ;;  %990 = vmatmul.mubr.msk.bf16.vlgmr.msra.gmra.mrb[0].mxu0 %vm296_vm3, %v1144_v41  ;;  %v1148_v45 = vld [vmem:[%s1578_s9 + $0x18] sm:$0xff]  }
 0x3d9   :  { %998 = vmatmul.mubr.msk.bf16.vlgmr.msra.gmra.mrb[0].mxu1 %vm296_vm3, %v1145_v42  ;;  %993 = vmatprep.mubr.msk.bf16.mxu0 %vm296_vm3, %v1146_v43  ;;  %v1149_v46 = vld [vmem:[%s1578_s9 + $0x38] sm:$0xff]  }
 0x3da   :  { %1001 = vmatprep.mubr.msk.bf16.mxu1 %vm296_vm3, %v1147_v44 }
 0x3e0   :  { %994 = vmatmul.mubr.msk.bf16.gmra.mrb[4].mxu0 %vm296_vm3, %v1148_v45 }
 0x3e1   :  { %1002 = vmatmul.mubr.msk.bf16.gmra.mrb[4].mxu1 %vm296_vm3, %v1149_v46 }
 0x4ab   :  { %v991_v51 = vpop.f32.mrb[0].mxu0 }
 0x4ac   :  { %v999_v53 = vpop.f32.mrb[0].mxu1  ;;  %v575_v54 = vpop.f32.mrb[1].mxu0  ;;  %v584_v58 = vadd.f32 %v991_v51, %v900_v52 }
 0x4ad   :  { %v607_v55 = vpop.f32.mrb[1].mxu1  ;;  %v992_v56 = vpop.f32.mrb[2].mxu0  ;;  %v616_v59 = vadd.f32 %v999_v53, %v900_v52  ;;  %v576_v4 = vadd.f32 %v900_v52, %v575_v54 }
 0x4ae   :  { %v1000_v57 = vpop.f32.mrb[2].mxu1  ;;  %v587_v60 = vadd.f32 %v992_v56, %v900_v52  ;;  %v578_v62 = vpop.f32.mrb[3].mxu0  ;;  %v608_v5 = vadd.f32 %v900_v52, %v607_v55 }
 0x4af   :  { %v619_v61 = vadd.f32 %v1000_v57, %v900_v52  ;;  %v610_v63 = vpop.f32.mrb[3].mxu1  ;;  %v579_v6 = vadd.f32 %v900_v52, %v578_v62 }
 0x4b0   :  { %v611_v0 = vadd.f32 %v900_v52, %v610_v63  ;;  %v639_v1 = vpack.c.bf16 %v587_v60, %v584_v58 }
 0x4b1   :  { %v643_v2 = vpack.c.bf16 %v619_v61, %v616_v59  ;;  %v638_v3 = vpack.c.bf16 %v579_v6, %v576_v4 }
 0x4b2   :  { %v642_v7 = vpack.c.bf16 %v611_v0, %v608_v5  ;;  %647 = vst [vmem:[#allocation2 + $0x8] sm:$0xff] %v639_v1 }
 0x4b3   :  { %651 = vst [vmem:[#allocation2 + $0x28] sm:$0xff] %v643_v2  ;;  %646 = vst [vmem:[#allocation2] sm:$0xff] %v638_v3  ;;  %v995_v8 = vpop.f32.mrb[4].mxu0 }
 0x4b4   :  { %650 = vst [vmem:[#allocation2 + $0x20] sm:$0xff] %v642_v7  ;;  %v1003_v9 = vpop.f32.mrb[4].mxu1  ;;  %v591_v10 = vpop.f32.mrb[5].mxu0  ;;  %v600_v14 = vadd.f32 %v995_v8, %v900_v52 }
 0x4b5   :  { %v623_v11 = vpop.f32.mrb[5].mxu1  ;;  %v996_v12 = vpop.f32.mrb[6].mxu0  ;;  %v632_v15 = vadd.f32 %v1003_v9, %v900_v52  ;;  %v592_v20 = vadd.f32 %v900_v52, %v591_v10 }
 0x4b6   :  { %v1004_v13 = vpop.f32.mrb[6].mxu1  ;;  %v603_v16 = vadd.f32 %v996_v12, %v900_v52  ;;  %v594_v18 = vpop.f32.mrb[7].mxu0  ;;  %v624_v21 = vadd.f32 %v900_v52, %v623_v11 }
 0x4b7   :  { %v635_v17 = vadd.f32 %v1004_v13, %v900_v52  ;;  %v626_v19 = vpop.f32.mrb[7].mxu1  ;;  %v595_v22 = vadd.f32 %v900_v52, %v594_v18 }
 0x4b8   :  { %v627_v23 = vadd.f32 %v900_v52, %v626_v19  ;;  %v641_v24 = vpack.c.bf16 %v603_v16, %v600_v14 }
 0x4b9   :  { %v645_v25 = vpack.c.bf16 %v635_v17, %v632_v15  ;;  %v640_v26 = vpack.c.bf16 %v595_v22, %v592_v20 }
 0x4ba   :  { %v644_v27 = vpack.c.bf16 %v627_v23, %v624_v21  ;;  %649 = vst [vmem:[#allocation2 + $0x18] sm:$0xff] %v641_v24 }
 0x4bb   :  { %653 = vst [vmem:[#allocation2 + $0x38] sm:$0xff] %v645_v25  ;;  %648 = vst [vmem:[#allocation2 + $0x10] sm:$0xff] %v640_v26 }
 0x4bc   :  { %652 = vst [vmem:[#allocation2 + $0x30] sm:$0xff] %v644_v27 }
 0x4bd LB: > { %v1150_v28 = vld [vmem:[%s1576_s7] sm:$0xff]   ;;  %v1276_v29 = vmov 0.0   ;;  %v1151_v30 = vld [vmem:[%s1576_s7 + $0x8] sm:$0xff]   ;;  %vm1277_vm5 = vmmov 0   ;;  %s1278_s26 = smov 32   ;;  %v669_v31 = vpack.c.bf16 %v1258_v48, %v1262_v47  ;;  %s919_s5 = sshll.u32 %s1266_s1, 4  ;;  %s1266_s1 = sphi %s1520_s1, %s663_s1   ;;  %v1262_v47 = vphi %v654_v47, %v813_v47   ;;  %v1258_v48 = vphi %v655_v48, %v815_v48   ;;  %v1254_v49 = vphi %v656_v49, %v821_v49   ;;  %v1250_v50 = vphi %v657_v50, %v823_v50  }
 0x4be   : > { %1005 = vmatprep.subr.bf16.mxu0 %v1276_v29  ;;  %1009 = vmatprep.mubr.msk.bf16.mxu0 %vm1277_vm5, %v1276_v29  ;;  %s730_s4 = sshra.s32 %s919_s5, 4  ;;  %s1279_s27 = smov 64  }
 0x4bf   : > { %1006 = vmatpush3.bf16.msra.mxu0 %v1150_v28  ;;  %751 = vrot.lane.b32.xlu1 %v1254_v49, %s1278_s26  ;;  %s923_s0 = sshll.u32 %s730_s4, 3  ;;  %s1280_s28 = smov 96  }
 0x4c0   : > { %1007 = vmatprep.subr.bf16.mxu0 %v1276_v29  ;;  %s733_s6 = scalar_lea.vmem [#allocation2], %s923_s0  ;;  %s803_s29 = sshra.s32 %s919_s5, 3 }
 0x4c1   : > { %s926_s30 = sshll.u32 %s803_s29, 2  ;;  %s663_s1 = sadd.s32 1, %s1266_s1  }
 0x4c2   : > { %s806_s11 = scalar_lea.vmem %s1578_s9, %s926_s30  ;;  %p660_p9 = scmp.ge.s32.totalorder %s663_s1, 8  }
 0x4c3   : > { %1008 = vmatpush3.bf16.msra.mxu0 %v1151_v30  ;;  %753 = vrot.lane.b32.xlu1 %v1250_v50, %s1278_s26  ;;  %v734_v32 = vld [vmem:[%s733_s6] sm:$0xff] }
 0x4c4   : > { %v735_v33 = vunpack.c.l.bf16 %v734_v32  ;;  %v736_v34 = vunpack.c.h.bf16 %v734_v32 }
 0x4c6   : > { %1010 = vmatmul.mubr.msk.bf16.vlgmr.msra.gmra.mrb[0].mxu0 %vm296_vm3, %v669_v31 }
 0x531   : > { %v752_v55 = vpop.permute.xlu1 %751 }
 0x535   : > { %v754_v57 = vpop.permute.xlu1 %753 }
 0x599   : > { %v723_v35 = vpop.f32.mrb[0].mxu0 }
 0x59a   : > { %v737_v36 = vadd.f32 %v735_v33, %v723_v35  ;;  %v1011_v37 = vpop.f32.mrb[1].mxu0 }
 0x59b   : > { %v726_v38 = vpop.f32.mrb[2].mxu0 }
 0x59c   : > { %1152 = vtanh.f32 %v737_v36  ;;  %v738_v39 = vadd.f32 %v736_v34, %v726_v38  ;;  %v1012_v40 = vpop.f32.mrb[3].mxu0  ;;  %v739_v43 = vmul.f32 0.5, %v737_v36 }
 0x59e   : > { %1154 = vtanh.f32 %v738_v39  ;;  %v740_v44 = vmul.f32 0.5, %v738_v39 }
 0x59f   : > { %1156 = vtanh.f32 %v739_v43 }
 0x5a0   : > { %1158 = vtanh.f32 %v740_v44 }
 0x5a6   : > { %v1153_v41 = vpop.eup %1152 }
 0x5a7   : > { %761 = vrot.lane.b32.xlu0 %v1153_v41, %s1279_s27 }
 0x5a8   : > { %v1155_v42 = vpop.eup %1154 }
 0x5a9   : > { %v1157_v45 = vpop.eup %1156 }
 0x5aa   : > { %v743_v46 = vadd.f32 1.0, %v1157_v45  ;;  %v1159_v47 = vpop.eup %1158 }
 0x5ab   : > { %763 = vrot.lane.b32.xlu0 %v1155_v42, %s1279_s27  ;;  %v744_v49 = vadd.f32 1.0, %v1159_v47 }
 0x5ac   : > { %v745_v48 = vmul.f32 0.5, %v743_v46 }
 0x5ad   : > { %v746_v52 = vmul.f32 0.5, %v744_v49 }
 0x5ae   : > { %v757_v56 = vmul.f32 %v752_v55, %v745_v48 }
 0x5af   : > { %v758_v60 = vmul.f32 %v754_v57, %v746_v52 }
 0x619   : > { %v762_v50 = vpop.permute.xlu0 %761 }
 0x61a   : > { %v767_v51 = vmul.f32 %v762_v50, %v745_v48 }
 0x61c   : > { %771 = vrot.lane.b32.xlu0 %v767_v51, %s1278_s26 }
 0x61d   : > { %v764_v53 = vpop.permute.xlu0 %763 }
 0x61e   : > { %v768_v54 = vmul.f32 %v764_v53, %v746_v52 }
 0x620   : > { %773 = vrot.lane.b32.xlu1 %v768_v54, %s1278_s26 }
 0x68e   : > { %v772_v58 = vpop.permute.xlu0 %771 }
 0x68f   : > { %v777_v59 = vadd.f32 %v772_v58, %v757_v56 }
 0x691   : > { %1160 = vtanh.f32 %v777_v59 }
 0x692   : > { %v774_v61 = vpop.permute.xlu1 %773 }
 0x693   : > { %v778_v62 = vadd.f32 %v774_v61, %v758_v60 }
 0x695   : > { %1162 = vtanh.f32 %v778_v62 }
 0x69b   : > { %v1161_v63 = vpop.eup %1160 }
 0x69c   : > { %783 = vrot.lane.b32.xlu0 %v1161_v63, %s1279_s27 }
 0x69f   : > { %v1163_v4 = vpop.eup %1162 }
 0x6a0   : > { %785 = vrot.lane.b32.xlu1 %v1163_v4, %s1279_s27 }
 0x70e   : > { %v784_v5 = vpop.permute.xlu0 %783 }
 0x70f   : > { %v789_v6 = vmul.f32 %v784_v5, %v745_v48 }
 0x711   : > { %812 = vrot.lane.b32.xlu0 %v789_v6, %s1278_s26  ;;  %v929_v1 = vpack.c.bf16 %v789_v6, %v789_v6 }
 0x712   : > { %v786_v0 = vpop.permute.xlu1 %785 }
 0x713   : > { %v790_v2 = vmul.f32 %v786_v0, %v746_v52 }
 0x715   : > { %797 = vrot.lane.b32.xlu0 %v929_v1, %s1278_s26  ;;  %814 = vrot.lane.b32.xlu1 %v790_v2, %s1278_s26  ;;  %v930_v3 = vpack.c.bf16 %v790_v2, %v790_v2 }
 0x719   : > { %820 = vrot.lane.b32.xlu0 %v777_v59, %s1280_s28  ;;  %799 = vrot.lane.b32.xlu1 %v930_v3, %s1278_s26 }
 0x71d   : > { %822 = vrot.lane.b32.xlu1 %v778_v62, %s1280_s28 }
 0x783   : > { %v813_v47 = vpop.permute.xlu0 %812  }
 0x787   : > { %v798_v7 = vpop.permute.xlu0 %797  ;;  %v815_v48 = vpop.permute.xlu1 %814  }
 0x788   : > { %808 = vst.msk [vmem:[%s806_s11] sm:$0xf] %vm418_vm4, %v798_v7 }
 0x789   :  { %662 = sbr.rel (!%p660_p9) target bundleno = 1213 (0x4bd), region = 89 }
 0x78b   : > { %v821_v49 = vpop.permute.xlu0 %820   ;;  %v800_v8 = vpop.permute.xlu1 %799 }
 0x78c   : > { %809 = vst.msk [vmem:[%s806_s11 + $0x4] sm:$0xf] %vm418_vm4, %v800_v8 }
 0x78f   : > { %v823_v50 = vpop.permute.xlu1 %822  }
 0x790   :  { %830 = vsyncpa [#allocation4], 1 }

</bundles_post_ra>
